<compile_context>
chip_gen: v7x
topology: tpu7x:2x2x1
jax: 0.10.0
libtpu: 0.0.40
codegen_flags: <defaults>
</compile_context>

<pallas_src>
import functools

import jax
import jax.numpy as jnp
from jax.experimental import pallas as pl
from jax.experimental.pallas import tpu as pltpu


NEG_SLOPE = 0.01  # torch.nn.LeakyReLU default negative_slope


def _leaky_relu(x):
    return jnp.where(x > 0, x, NEG_SLOPE * x)


def _round_up(n, m):
    return ((n + m - 1) // m) * m


def mlp_kernel(x_ref, w1_ref, b1_ref, w2_ref, b2_ref, o_ref):
    x = x_ref[...]                      # [tile, latent_dim]
    w1 = w1_ref[...]                    # [latent_dim, H_pad]
    latent_dim = x.shape[1]
    tile = x.shape[0]
    h_width = w1.shape[1]

    # ---- Layer 1: Linear(latent_dim -> hidden) + LeakyReLU -----------------
    if latent_dim <= 8:
        # K is tiny: a K=latent_dim MXU matmul is pure push/drain latency.
        # Do it as broadcast multiply-adds on the VPU instead (static unroll).
        h = jnp.broadcast_to(b1_ref[...], (tile, h_width))
        for k in range(latent_dim):
            h = h + x[:, k:k + 1] * w1[k:k + 1, :]
    else:
        h = jnp.dot(x, w1, preferred_element_type=jnp.float32) + b1_ref[...]
    h = _leaky_relu(h)                  # [tile, H_pad], full 128-lane slab

    # ---- Layer 2: Linear(hidden -> num_classes), lane-dense output ---------
    out = jnp.dot(h, w2_ref[...], preferred_element_type=jnp.float32)
    o_ref[...] = (out + b2_ref[...]).astype(o_ref.dtype)


@functools.partial(jax.jit, static_argnames=("batch_tile",))
def latent_classifier(x, params, *, batch_tile=None):
    """Fused MLP forward.  x: [B, latent_dim] float32.  Returns [B, num_classes]."""
    B, latent_dim = x.shape
    hidden_dim = params["w1"].shape[1]
    num_classes = params["w2"].shape[1]

    # Lane-dense padded feature widths.
    h_pad = _round_up(hidden_dim, 128)
    c_pad = _round_up(num_classes, 128)

    if batch_tile is None:
        batch_tile = min(512, _round_up(B, 8))
    batch_tile = max(8, _round_up(batch_tile, 8))
    b_pad = _round_up(B, batch_tile)

    dt = x.dtype
    w1 = jnp.zeros((latent_dim, h_pad), dt).at[:, :hidden_dim].set(params["w1"])
    b1 = jnp.zeros((1, h_pad), dt).at[:, :hidden_dim].set(
        params["b1"].reshape(1, -1))
    w2 = jnp.zeros((h_pad, c_pad), dt).at[:hidden_dim, :num_classes].set(
        params["w2"])
    b2 = jnp.zeros((1, c_pad), dt).at[:, :num_classes].set(
        params["b2"].reshape(1, -1))

    x_p = x if b_pad == B else jnp.pad(x, ((0, b_pad - B), (0, 0)))

    grid = (b_pad // batch_tile,)

    # Batch tiled across the grid; weights/biases replicated (constant index
    # map -> resident in VMEM across every grid step).
    in_specs = [
        pl.BlockSpec((batch_tile, latent_dim), lambda i: (i, 0)),
        pl.BlockSpec((latent_dim, h_pad), lambda i: (0, 0)),
        pl.BlockSpec((1, h_pad), lambda i: (0, 0)),
        pl.BlockSpec((h_pad, c_pad), lambda i: (0, 0)),
        pl.BlockSpec((1, c_pad), lambda i: (0, 0)),
    ]
    out_spec = pl.BlockSpec((batch_tile, c_pad), lambda i: (i, 0))

    flops = 2 * b_pad * (latent_dim * h_pad + h_pad * c_pad)
    bytes_accessed = 4 * (b_pad * latent_dim + b_pad * c_pad
                          + latent_dim * h_pad + h_pad
                          + h_pad * c_pad + c_pad)

    out_padded = pl.pallas_call(
        mlp_kernel,
        out_shape=jax.ShapeDtypeStruct((b_pad, c_pad), jnp.float32),
        grid=grid,
        in_specs=in_specs,
        out_specs=out_spec,
        compiler_params=pltpu.CompilerParams(
            dimension_semantics=("parallel",)),
        cost_estimate=pl.CostEstimate(
            flops=int(flops),
            transcendentals=0,
            bytes_accessed=int(bytes_accessed)),
    )(x_p, w1, b1, w2, b2)

    return out_padded[:B, :num_classes]


def init_params(key, latent_dim, hidden_dim, num_classes):
    """Deterministic init mirroring torch.nn.Linear's U(-1/sqrt(fan_in), +)."""
    dims = [(latent_dim, hidden_dim), (hidden_dim, num_classes)]
    params = {}
    keys = jax.random.split(key, 2 * len(dims))
    for idx, (fan_in, fan_out) in enumerate(dims):
        bound = 1.0 / jnp.sqrt(jnp.float32(fan_in))
        w = jax.random.uniform(keys[2 * idx], (fan_in, fan_out),
                               minval=-bound, maxval=bound, dtype=jnp.float32)
        b = jax.random.uniform(keys[2 * idx + 1], (1, fan_out),
                               minval=-bound, maxval=bound, dtype=jnp.float32)
        params[f"w{idx + 1}"] = w
        params[f"b{idx + 1}"] = b
    return params


def reference_mlp(x, p):
    h = _leaky_relu(x @ p["w1"] + p["b1"])
    return h @ p["w2"] + p["b2"]


if __name__ == "__main__":
    latent_dim, hidden_dim, num_classes = 2, 32, 10

    key = jax.random.PRNGKey(0)
    k_x, k_p = jax.random.split(key)
    params = init_params(k_p, latent_dim, hidden_dim, num_classes)

    ok = True
    # Check both an aligned batch and a ragged batch (exercises padding path).
    for B in (8, 13):
        x = jax.random.normal(jax.random.fold_in(k_x, B), (B, latent_dim),
                              dtype=jnp.float32)
        out = jax.block_until_ready(latent_classifier(x, params))
        ref = reference_mlp(x, params)
        ok &= out.shape == (B, num_classes)
        ok &= bool(jnp.allclose(out, ref, atol=1e-5, rtol=1e-5))

    assert ok, "mismatch vs reference"
    print("KERNEL_OK")
</pallas_src>

<mosaic_0001>
module attributes {stable_mosaic.version = 11 : i64} {
  func.func @mlp_kernel(%arg0: i32, %arg1: memref<8x2xf32, #tpu.memory_space<vmem>>, %arg2: memref<2x128xf32, #tpu.memory_space<vmem>>, %arg3: memref<1x128xf32, #tpu.memory_space<vmem>>, %arg4: memref<128x128xf32, #tpu.memory_space<vmem>>, %arg5: memref<1x128xf32, #tpu.memory_space<vmem>>, %arg6: memref<8x128xf32, #tpu.memory_space<vmem>>) attributes {dimension_semantics = [#tpu.dimension_semantics<parallel>], iteration_bounds = array<i64: 1>, scalar_prefetch = 0 : i64, scratch_operands = 0 : i64, tpu.core_type = #tpu.core_type<tc>, window_params = [{transform_indices = @transform_0, window_bounds = array<i64: 8, 2>}, {pipeline_mode = #tpu.pipeline_mode<synchronous>, transform_indices = @transform_1, window_bounds = array<i64: 2, 128>}, {pipeline_mode = #tpu.pipeline_mode<synchronous>, transform_indices = @transform_2, window_bounds = array<i64: 1, 128>}, {pipeline_mode = #tpu.pipeline_mode<synchronous>, transform_indices = @transform_3, window_bounds = array<i64: 128, 128>}, {pipeline_mode = #tpu.pipeline_mode<synchronous>, transform_indices = @transform_4, window_bounds = array<i64: 1, 128>}, {transform_indices = @transform_5, window_bounds = array<i64: 8, 128>}]} {
    %c0 = arith.constant 0 : index
    %c0_0 = arith.constant 0 : index
    %0 = vector.load %arg1[%c0, %c0_0] : memref<8x2xf32, #tpu.memory_space<vmem>>, vector<8x2xf32>
    %c0_1 = arith.constant 0 : index
    %c0_2 = arith.constant 0 : index
    %1 = vector.load %arg2[%c0_1, %c0_2] : memref<2x128xf32, #tpu.memory_space<vmem>>, vector<2x128xf32>
    %c0_3 = arith.constant 0 : index
    %c0_4 = arith.constant 0 : index
    %2 = vector.load %arg3[%c0_3, %c0_4] : memref<1x128xf32, #tpu.memory_space<vmem>>, vector<1x128xf32>
    %3 = vector.shape_cast %2 : vector<1x128xf32> to vector<1x128xf32>
    %4 = vector.broadcast %3 : vector<1x128xf32> to vector<8x128xf32>
    %5 = vector.extract_strided_slice %0 {offsets = [0, 0], sizes = [8, 1], strides = [1, 1]} : vector<8x2xf32> to vector<8x1xf32>
    %6 = vector.extract_strided_slice %1 {offsets = [0, 0], sizes = [1, 128], strides = [1, 1]} : vector<2x128xf32> to vector<1x128xf32>
    %7 = vector.broadcast %5 : vector<8x1xf32> to vector<8x128xf32>
    %8 = vector.broadcast %6 : vector<1x128xf32> to vector<8x128xf32>
    %9 = arith.mulf %7, %8 : vector<8x128xf32>
    %10 = arith.addf %4, %9 : vector<8x128xf32>
    %11 = vector.extract_strided_slice %0 {offsets = [0, 1], sizes = [8, 1], strides = [1, 1]} : vector<8x2xf32> to vector<8x1xf32>
    %12 = vector.extract_strided_slice %1 {offsets = [1, 0], sizes = [1, 128], strides = [1, 1]} : vector<2x128xf32> to vector<1x128xf32>
    %13 = vector.broadcast %11 : vector<8x1xf32> to vector<8x128xf32>
    %14 = vector.broadcast %12 : vector<1x128xf32> to vector<8x128xf32>
    %15 = arith.mulf %13, %14 : vector<8x128xf32>
    %16 = arith.addf %10, %15 : vector<8x128xf32>
    %cst = arith.constant 0.000000e+00 : f32
    %17 = vector.broadcast %cst : f32 to vector<8x128xf32>
    %18 = arith.cmpf ogt, %16, %17 : vector<8x128xf32>
    %cst_5 = arith.constant 0.00999999977 : f32
    %19 = vector.broadcast %cst_5 : f32 to vector<8x128xf32>
    %20 = arith.mulf %19, %16 : vector<8x128xf32>
    %21 = arith.select %18, %16, %20 : vector<8x128xi1>, vector<8x128xf32>
    %c0_6 = arith.constant 0 : index
    %c0_7 = arith.constant 0 : index
    %22 = vector.load %arg4[%c0_6, %c0_7] : memref<128x128xf32, #tpu.memory_space<vmem>>, vector<128x128xf32>
    %cst_8 = arith.constant dense<0.000000e+00> : vector<8x128xf32>
    %23 = tpu.matmul %21, %22, %cst_8 {dimension_numbers = #tpu.dot_dimension_numbers<[1], [0], [0], [1], [0, 0, 1, 1], [], []>} : vector<8x128xf32>, vector<128x128xf32>, vector<8x128xf32> -> vector<8x128xf32>
    %c0_9 = arith.constant 0 : index
    %c0_10 = arith.constant 0 : index
    %24 = vector.load %arg5[%c0_9, %c0_10] : memref<1x128xf32, #tpu.memory_space<vmem>>, vector<1x128xf32>
    %25 = vector.broadcast %24 : vector<1x128xf32> to vector<8x128xf32>
    %26 = arith.addf %23, %25 : vector<8x128xf32>
    %c0_11 = arith.constant 0 : index
    %c0_12 = arith.constant 0 : index
    %27 = vector.load %arg6[%c0_11, %c0_12] : memref<8x128xf32, #tpu.memory_space<vmem>>, vector<8x128xf32>
    tpu.vector_store %arg6[%c0_11, %c0_12], %26 {strides = array<i32>} : memref<8x128xf32, #tpu.memory_space<vmem>>, vector<8x128xf32>,
    return
  }
  func.func @transform_0(%arg0: i32) -> (i32, i32) {
    %c0_i32 = arith.constant 0 : i32
    %c0_i32_0 = arith.constant 0 : i32
    return %arg0, %c0_i32 : i32, i32
  }
  func.func @transform_1(%arg0: i32) -> (i32, i32) {
    %c0_i32 = arith.constant 0 : i32
    %c0_i32_0 = arith.constant 0 : i32
    %c0_i32_1 = arith.constant 0 : i32
    return %c0_i32, %c0_i32_0 : i32, i32
  }
  func.func @transform_2(%arg0: i32) -> (i32, i32) {
    %c0_i32 = arith.constant 0 : i32
    %c0_i32_0 = arith.constant 0 : i32
    %c0_i32_1 = arith.constant 0 : i32
    return %c0_i32, %c0_i32_0 : i32, i32
  }
  func.func @transform_3(%arg0: i32) -> (i32, i32) {
    %c0_i32 = arith.constant 0 : i32
    %c0_i32_0 = arith.constant 0 : i32
    %c0_i32_1 = arith.constant 0 : i32
    return %c0_i32, %c0_i32_0 : i32, i32
  }
  func.func @transform_4(%arg0: i32) -> (i32, i32) {
    %c0_i32 = arith.constant 0 : i32
    %c0_i32_0 = arith.constant 0 : i32
    %c0_i32_1 = arith.constant 0 : i32
    return %c0_i32, %c0_i32_0 : i32, i32
  }
  func.func @transform_5(%arg0: i32) -> (i32, i32) {
    %c0_i32 = arith.constant 0 : i32
    %c0_i32_0 = arith.constant 0 : i32
    return %arg0, %c0_i32 : i32, i32
  }
}

</mosaic_0001>

<bundles_post_ra>
// kernel: latent_classifier.1
= control target key start
LH: loop header
LB: loop body
LE: loop exit
PB: predicated region body
PF: predicated region fallthrough
CT: control target
= control target key end

     0   :  { %v272_v3 = vmov 0   ;;  %v273_v4 = vmov 0.0|0.0   ;;  %s380_s0 = inlined_call_operand.vmem [shape: f32[8,2], index: 0, kind: input, shape index: {}]   ;;  %s381_s1 = inlined_call_operand.vmem [shape: f32[2,128], index: 1, kind: input, shape index: {}]   ;;  %s382_s2 = inlined_call_operand.vmem [shape: f32[1,128], index: 2, kind: input, shape index: {}]   ;;  %s383_s3 = inlined_call_operand.vmem [shape: f32[128,128], index: 3, kind: input, shape index: {}]   ;;  %s384_s4 = inlined_call_operand.vmem [shape: f32[1,128], index: 4, kind: input, shape index: {}]   ;;  %s385_s5 = inlined_call_operand.hbm [shape: f32[8,128], index: 5, kind: output, shape index: {}]  }
   0x1   :  { %v21_v0 = vld [vmem:[%s380_s0] sm:$0xff]  ;;  %v55_v2 = vld [vmem:[%s383_s3 + $0x8] sm:$0xff]  ;;  %246 = vset.pattern.permute.xlu0 %v272_v3  ;;  %216 = vmatprep.subr.bf16.mxu0 %v273_v4  ;;  %v56_v6 = vld [vmem:[%s383_s3 + $0x10] sm:$0xff] }
   0x2   :  { %v54_v1 = vld [vmem:[%s383_s3] sm:$0xff]  ;;  %v57_v7 = vld [vmem:[%s383_s3 + $0x18] sm:$0xff]  ;;  %32 = vperm.xlu0 %246, %v21_v0   ;;  %v59_v10 = vld [vmem:[%s383_s3 + $0x28] sm:$0xff] }
   0x3   :  { %v217_v5 = vpack.c.bf16 %v55_v2, %v54_v1  ;;  %v220_v8 = vpack.c.bf16 %v57_v7, %v56_v6  ;;  %v58_v9 = vld [vmem:[%s383_s3 + $0x20] sm:$0xff] }
   0x5   :  { %218 = vmatpush3.bf16.msra.mxu0 %v217_v5 }
   0x6   :  { %219 = vmatprep.subr.bf16.mxu0 %v273_v4 }
   0x7   :  { %10 = vsyncpa [#allocation3], 0  ;;  %v274_v11 = vmov 1   ;;  %v223_v12 = vpack.c.bf16 %v59_v10, %v58_v9  ;;  %v60_v13 = vld [vmem:[%s383_s3 + $0x30] sm:$0xff]  ;;  %v61_v14 = vld [vmem:[%s383_s3 + $0x38] sm:$0xff]  ;;  %vm275_vm0 = vmmov 0   ;;  %v35_v29 = vlaneseq }
   0x8   :  { %247 = vset.pattern.permute.xlu0 %v274_v11  ;;  %v276_v15 = vmov 0.0   ;;  %v226_v16 = vpack.c.bf16 %v61_v14, %v60_v13  ;;  %v62_v17 = vld [vmem:[%s383_s3 + $0x40] sm:$0xff]  ;;  %v63_v18 = vld [vmem:[%s383_s3 + $0x48] sm:$0xff]  ;;  %v64_v20 = vld [vmem:[%s383_s3 + $0x50] sm:$0xff] }
   0x9   :  { %42 = vperm.xlu0 %247, %v21_v0   ;;  %221 = vmatpush3.bf16.msra.mxu0 %v220_v8  ;;  %v229_v19 = vpack.c.bf16 %v63_v18, %v62_v17  ;;  %v65_v21 = vld [vmem:[%s383_s3 + $0x58] sm:$0xff]  ;;  %v66_v23 = vld [vmem:[%s383_s3 + $0x60] sm:$0xff]  ;;  %v67_v24 = vld [vmem:[%s383_s3 + $0x68] sm:$0xff]  ;;  %v36_v30 = vshrl.u32 %v35_v29, 7 }
   0xa   :  { %222 = vmatprep.subr.bf16.mxu0 %v273_v4  ;;  %213 = vmatprep.mubr.msk.f32.mxu0 %vm275_vm0, %v276_v15  ;;  %v232_v22 = vpack.c.bf16 %v65_v21, %v64_v20  ;;  %v235_v25 = vpack.c.bf16 %v67_v24, %v66_v23  ;;  %v68_v26 = vld [vmem:[%s383_s3 + $0x70] sm:$0xff]  ;;  %v69_v27 = vld [vmem:[%s383_s3 + $0x78] sm:$0xff]  ;;  %v22_v32 = vld [vmem:[%s381_s1] sm:$0x3]  ;;  %s277_s1 = smov [#allocation2]  }
   0xb   :  { %v238_v28 = vpack.c.bf16 %v69_v27, %v68_v26  ;;  %v37_v31 = vsub.s32 0, %v36_v30  ;;  %v47_v34 = vsub.s32 1, %v36_v30  ;;  %v162_v38 = vld [vmem:[%s382_s2] ss:$0 sm:$0xff]  ;;  %s154_s30 = sshll.u32 %s277_s1, 4  ;;  %s155_s30 = int_to_ptr.vmem [resolvable:$true] %s154_s30 }
   0xc   :  { %v163_v45 = vld [vmem:[%s384_s4] ss:$0 sm:$0xff]  ;;  %s248_s2 = scalar_lea.vmem %s155_s30, 128  ;;  %p253_p1 = scmp.lt.s32.totalorder %s155_s30, %s155_s30 }
   0xd   :  { %224 = vmatpush3.bf16.msra.mxu0 %v223_v12  ;;  %v38_v33 = vrot.slane %v22_v32, %v37_v31  ;;  %v48_v37 = vrot.slane %v22_v32, %v47_v34  ;;  %p249_p0 = scmp.ne.s32.totalorder %s155_s30, %s248_s2  ;;  %p254_p2 = scmp.lt.s32.totalorder %s248_s2, %s248_s2 }
   0xe   :  { %225 = vmatprep.subr.bf16.mxu0 %v273_v4 }
   0xf   :  { %p255_p3 = por %p254_p2, %p253_p1 }
  0x11   :  { %227 = vmatpush3.bf16.msra.mxu0 %v226_v16  ;;  %p256_p4 = pnand %p255_p3, %p249_p0 }
  0x12   :  { %228 = vmatprep.subr.bf16.mxu0 %v273_v4 }
  0x15   :  { %230 = vmatpush3.bf16.msra.mxu0 %v229_v19 }
  0x16   :  { %231 = vmatprep.subr.bf16.mxu0 %v273_v4 }
  0x19   :  { %233 = vmatpush3.bf16.msra.mxu0 %v232_v22 }
  0x1a   :  { %234 = vmatprep.subr.bf16.mxu0 %v273_v4 }
  0x1d   :  { %236 = vmatpush3.bf16.msra.mxu0 %v235_v25 }
  0x1e   :  { %237 = vmatprep.subr.bf16.mxu0 %v273_v4 }
  0x21   :  { %239 = vmatpush3.bf16.msra.mxu0 %v238_v28 }
  0x81   :  { %v33_v35 = vpop.permute.xlu0 %32 }
  0x82   :  { %v39_v36 = vmul.f32 %v38_v33, %v33_v35 }
  0x84   :  { %v40_v40 = vadd.f32 %v162_v38, %v39_v36 }
  0x88   :  { %v43_v39 = vpop.permute.xlu0 %42 }
  0x89   :  { %v49_v41 = vmul.f32 %v48_v37, %v43_v39 }
  0x8b   :  { %v50_v42 = vadd.f32 %v49_v41, %v40_v40 }
  0x8d   :  { %vm51_vm1 = vcmp.gt.f32.partialorder %v50_v42, 0.0  ;;  %v52_v43 = vmul.f32 0.01, %v50_v42 }
  0x8f   :  { %v53_v44 = vsel %vm51_vm1, %v50_v42, %v52_v43 }
  0x90   :  { %214 = vmatmul.mubr.f32.vlgmr.msra.gmra.mrb[0].mxu0 %v53_v44 }
 0x163   :  { %v143_v46 = vpop.f32.mrb[0].mxu0 }
 0x164   :  { %v144_v47 = vadd.f32 %v163_v45, %v143_v46  ;;  %v215_v48 = vpop.f32.mrb[1].mxu0 }
 0x166   :  { %147 = vst [vmem:[#allocation2] sm:$0xff] %v144_v47 }
 0x167   :  { %259 = shalt.err (!%p256_p4)
}
 0x168   :  { %s260_s8 = scalar_lea.hbm %s385_s5, 128 }
 0x169   :  { %p261_p5 = scmp.ne.s32.totalorder %s385_s5, %s260_s8  ;;  %p264_p6 = scmp.lt.u32.totalorder %s260_s8, %s385_s5 }
 0x16b   :  { %p266_p7 = pnand %p264_p6, %p261_p5 }
 0x16d   :  { %269 = shalt.err (!%p266_p7)
}
 0x16e   :  { %157 = dma.vmem_to_hbm [thread:$0]  %s155_s30, 128, %s385_s5, [#allocation3]  }
 0x16f   :  { %270 = dma.done.wait [#allocation3], 128  }
 0x170   :  { %271 = vsyncadd [#allocation3], 4294967168 }
 0x171   :  { %161 = vsyncpa [#allocation3], 1 }

</bundles_post_ra>
